<compile_context>
chip_gen: v5e
topology: v5e:2x2
jax: 0.10.0
libtpu: 0.0.40
codegen_flags: <defaults>
</compile_context>

<pallas_src>
import math

import jax
import jax.numpy as jnp
from jax import lax
from jax.experimental import pallas as pl
from jax.experimental.pallas import tpu as pltpu

EPS = 1e-5
NEG_SLOPE = 0.01  # nn.LeakyReLU default


def _stage_body(x_ref, wb_ref, sc_ref, sh_ref, o_ref, pad_ref, res_ref=None):
    """One stage: y = conv3x3(leaky_relu(x * scale + shift)) [+ residual].

    Processes one batch element per grid step in a (H, W*C) layout
    (rows on the sublane axis, W*C folded onto the lane axis).
    """
    H = x_ref.shape[1]
    WC = x_ref.shape[2]

    x = x_ref[0].astype(jnp.float32)                     # (H, W*C)

    # Folded BatchNorm (scale/shift precomputed in the wrapper) + LeakyReLU.
    h = x * sc_ref[...] + sh_ref[...]
    h = jnp.where(h > 0, h, NEG_SLOPE * h)

    # Vertical 1-row zero halo only; horizontal zero-padding is folded into
    # the banded weights.  The interior rows are fully overwritten every
    # step, so only the two halo rows need zeroing (done every step so it
    # stays correct if the 'parallel' batch axis is split across cores).
    zero_row = jnp.zeros((1, WC), jnp.float32)
    pad_ref[0:1, :] = zero_row
    pad_ref[H + 1:H + 2, :] = zero_row
    pad_ref[1:H + 1, :] = h

    # 3x3 conv as 3 banded matmuls (one per vertical tap): each is
    # (H, W*C) @ (W*C, W*C) on the MXU with f32 accumulation, instead of
    # nine (.., C) @ (C, C) dots.
    acc = jnp.dot(pad_ref[0:H, :], wb_ref[0],
                  preferred_element_type=jnp.float32)
    acc = acc + jnp.dot(pad_ref[1:H + 1, :], wb_ref[1],
                        preferred_element_type=jnp.float32)
    acc = acc + jnp.dot(pad_ref[2:H + 2, :], wb_ref[2],
                        preferred_element_type=jnp.float32)

    if res_ref is not None:
        acc = acc + res_ref[0].astype(jnp.float32)
    o_ref[0] = acc.astype(o_ref.dtype)


def _stage_kernel(x_ref, wb_ref, sc_ref, sh_ref, o_ref, pad_ref):
    _stage_body(x_ref, wb_ref, sc_ref, sh_ref, o_ref, pad_ref)


def _stage_res_kernel(x_ref, res_ref, wb_ref, sc_ref, sh_ref, o_ref, pad_ref):
    _stage_body(x_ref, wb_ref, sc_ref, sh_ref, o_ref, pad_ref, res_ref=res_ref)


def _run_stage(kernel, x_f, wband, scale_wc, shift_wc, residual=None):
    """Launch one BN->LeakyReLU->Conv stage, gridded over the batch."""
    B, H, WC = x_f.shape
    per_img = pl.BlockSpec((1, H, WC), lambda b: (b, 0, 0))

    inputs = [x_f]
    in_specs = [per_img]
    if residual is not None:
        inputs.append(residual)
        in_specs.append(per_img)
    inputs += [wband, scale_wc, shift_wc]
    in_specs += [
        pl.BlockSpec(wband.shape, lambda b: (0, 0, 0)),
        pl.BlockSpec((1, WC), lambda b: (0, 0)),
        pl.BlockSpec((1, WC), lambda b: (0, 0)),
    ]

    return pl.pallas_call(
        kernel,
        out_shape=jax.ShapeDtypeStruct((B, H, WC), jnp.float32),
        grid=(B,),
        in_specs=in_specs,
        out_specs=per_img,
        scratch_shapes=[pltpu.VMEM((H + 2, WC), jnp.float32)],
        compiler_params=pltpu.CompilerParams(
            dimension_semantics=("parallel",),
            vmem_limit_bytes=32 * 1024 * 1024),
    )(*inputs)


def _band_weights(w, W):
    """Fold the horizontal (kw) taps of a (Cout, Cin, 3, 3) conv weight into
    block-banded matrices: returns (3, W*Cin, W*Cout), one per vertical tap,
    so conv3x3(padding=1) == sum_di pad_rows[di] @ band[di] in the
    (W, C)-folded lane layout (out-of-range horizontal taps simply vanish,
    which matches zero padding)."""
    Cout, Cin, KH, KW = w.shape
    bands = []
    for di in range(KH):
        b = jnp.zeros((W * Cin, W * Cout), jnp.float32)
        for dj in range(KW):
            # selector: input column w_in feeds output column w_out = w_in - (dj - 1)
            sel = jnp.eye(W, k=1 - dj, dtype=jnp.float32)        # (W, W)
            blk = w[:, :, di, dj].astype(jnp.float32).T          # (Cin, Cout)
            b = b + jnp.kron(sel, blk)
        bands.append(b)
    return jnp.stack(bands, axis=0)


def _bn_scale_shift(x_nhwc, gamma, beta):
    """Training-mode BatchNorm2d folded to per-channel scale/shift."""
    mean = jnp.mean(x_nhwc, axis=(0, 1, 2))
    var = jnp.mean(jnp.square(x_nhwc - mean), axis=(0, 1, 2))
    scale = gamma.astype(jnp.float32) * lax.rsqrt(var + EPS)
    shift = beta.astype(jnp.float32) - mean * scale
    return scale, shift


@jax.jit
def residual_conv_block(x_nchw, w1, w2, gamma1, beta1, gamma2, beta2):
    """x_nchw: (B, C, H, W); w*: (Cout, Cin, 3, 3); gamma/beta: (C,)."""
    B, C, H, W = x_nchw.shape
    x_nhwc = jnp.transpose(x_nchw, (0, 2, 3, 1)).astype(jnp.float32)
    x_f = x_nhwc.reshape(B, H, W * C)                     # (W, C) folded onto lanes

    wband1 = _band_weights(w1, W)
    wband2 = _band_weights(w2, W)

    # Stage 1: BN1 stats from x (trivial XLA reduction in the wrapper keeps
    # the kernel grid batch-parallel), then fused scale/shift + LReLU + conv1.
    s1, t1 = _bn_scale_shift(x_nhwc, gamma1, beta1)
    h1_f = _run_stage(_stage_kernel, x_f, wband1,
                      jnp.tile(s1, W).reshape(1, W * C),
                      jnp.tile(t1, W).reshape(1, W * C))

    # Stage 2: BN2 stats from conv1's output, then fused
    # scale/shift + LReLU + conv2 + residual add.
    s2, t2 = _bn_scale_shift(h1_f.reshape(B, H, W, C), gamma2, beta2)
    out_f = _run_stage(_stage_res_kernel, h1_f, wband2,
                       jnp.tile(s2, W).reshape(1, W * C),
                       jnp.tile(t2, W).reshape(1, W * C),
                       residual=x_f)

    out_nhwc = out_f.reshape(B, H, W, C)
    return jnp.transpose(out_nhwc, (0, 3, 1, 2)).astype(x_nchw.dtype)


def _reference(x_nchw, w1, w2, gamma1, beta1, gamma2, beta2):
    """Plain-JAX reference of the PyTorch forward (training-mode BN)."""
    def bn_lrelu(h, g, b):
        mean = jnp.mean(h, axis=(0, 2, 3), keepdims=True)
        var = jnp.mean((h - mean) ** 2, axis=(0, 2, 3), keepdims=True)
        hn = (h - mean) / jnp.sqrt(var + EPS) * g.reshape(1, -1, 1, 1) \
             + b.reshape(1, -1, 1, 1)
        return jnp.where(hn > 0, hn, NEG_SLOPE * hn)

    def conv(h, w):
        return jax.lax.conv_general_dilated(
            h, w, window_strides=(1, 1), padding=((1, 1), (1, 1)),
            dimension_numbers=("NCHW", "OIHW", "NCHW"))

    h = bn_lrelu(x_nchw, gamma1, beta1)
    h = conv(h, w1)
    h = bn_lrelu(h, gamma2, beta2)
    h = conv(h, w2)
    return h + x_nchw


if __name__ == "__main__":
    B, C, H, W = 2, 4, 16, 16
    key = jax.random.PRNGKey(0)
    kx, k1, k2 = jax.random.split(key, 3)

    x = jax.random.normal(kx, (B, C, H, W), jnp.float32)

    # Deterministic kaiming_normal_ (leaky_relu, a=0.01), fan_in = C*3*3.
    fan_in = C * 3 * 3
    gain = math.sqrt(2.0 / (1.0 + 0.01 ** 2))
    std = gain / math.sqrt(fan_in)
    w1 = jax.random.normal(k1, (C, C, 3, 3), jnp.float32) * std
    w2 = jax.random.normal(k2, (C, C, 3, 3), jnp.float32) * std

    gamma1 = jnp.ones((C,), jnp.float32)
    beta1 = jnp.zeros((C,), jnp.float32)
    gamma2 = jnp.ones((C,), jnp.float32)
    beta2 = jnp.zeros((C,), jnp.float32)

    out = residual_conv_block(x, w1, w2, gamma1, beta1, gamma2, beta2)
    out = jax.block_until_ready(out)

    ref = _reference(x, w1, w2, gamma1, beta1, gamma2, beta2)
    assert out.shape == (B, C, H, W)
    err = float(jnp.max(jnp.abs(out - ref)))
    assert jnp.allclose(out, ref, atol=1e-3, rtol=1e-3), err

    print("KERNEL_OK")
</pallas_src>

<mosaic_0001>
module attributes {stable_mosaic.version = 11 : i64} {
  func.func @_stage_kernel(%arg0: i32, %arg1: memref<1x16x64xf32, #tpu.memory_space<vmem>>, %arg2: memref<3x64x64xf32, #tpu.memory_space<vmem>>, %arg3: memref<1x64xf32, #tpu.memory_space<vmem>>, %arg4: memref<1x64xf32, #tpu.memory_space<vmem>>, %arg5: memref<1x16x64xf32, #tpu.memory_space<vmem>>, %arg6: memref<18x64xf32, #tpu.memory_space<vmem>>) attributes {dimension_semantics = [#tpu.dimension_semantics<parallel>], iteration_bounds = array<i64: 2>, scalar_prefetch = 0 : i64, scratch_operands = 1 : i64, tpu.core_type = #tpu.core_type<tc>, window_params = [{transform_indices = @transform_0, window_bounds = array<i64: 1, 16, 64>}, {pipeline_mode = #tpu.pipeline_mode<synchronous>, transform_indices = @transform_1, window_bounds = array<i64: 3, 64, 64>}, {pipeline_mode = #tpu.pipeline_mode<synchronous>, transform_indices = @transform_2, window_bounds = array<i64: 1, 64>}, {pipeline_mode = #tpu.pipeline_mode<synchronous>, transform_indices = @transform_3, window_bounds = array<i64: 1, 64>}, {transform_indices = @transform_4, window_bounds = array<i64: 1, 16, 64>}]} {
    %c0 = arith.constant 0 : index
    %c0_0 = arith.constant 0 : index
    %c0_1 = arith.constant 0 : index
    %0 = vector.load %arg1[%c0, %c0_0, %c0_1] : memref<1x16x64xf32, #tpu.memory_space<vmem>>, vector<1x16x64xf32>
    %1 = vector.shape_cast %0 : vector<1x16x64xf32> to vector<16x64xf32>
    %c0_2 = arith.constant 0 : index
    %c0_3 = arith.constant 0 : index
    %2 = vector.load %arg3[%c0_2, %c0_3] : memref<1x64xf32, #tpu.memory_space<vmem>>, vector<1x64xf32>
    %3 = vector.broadcast %2 : vector<1x64xf32> to vector<16x64xf32>
    %4 = arith.mulf %1, %3 : vector<16x64xf32>
    %c0_4 = arith.constant 0 : index
    %c0_5 = arith.constant 0 : index
    %5 = vector.load %arg4[%c0_4, %c0_5] : memref<1x64xf32, #tpu.memory_space<vmem>>, vector<1x64xf32>
    %6 = vector.broadcast %5 : vector<1x64xf32> to vector<16x64xf32>
    %7 = arith.addf %4, %6 : vector<16x64xf32>
    %cst = arith.constant 0.000000e+00 : f32
    %8 = vector.broadcast %cst : f32 to vector<16x64xf32>
    %9 = arith.cmpf ogt, %7, %8 : vector<16x64xf32>
    %cst_6 = arith.constant 0.00999999977 : f32
    %10 = vector.broadcast %cst_6 : f32 to vector<16x64xf32>
    %11 = arith.mulf %10, %7 : vector<16x64xf32>
    %12 = arith.select %9, %7, %11 : vector<16x64xi1>, vector<16x64xf32>
    %cst_7 = arith.constant 0.000000e+00 : f32
    %13 = vector.broadcast %cst_7 : f32 to vector<1x64xf32>
    %c0_8 = arith.constant 0 : index
    %c0_9 = arith.constant 0 : index
    %14 = vector.load %arg6[%c0_8, %c0_9] : memref<18x64xf32, #tpu.memory_space<vmem>>, vector<1x64xf32>
    tpu.vector_store %arg6[%c0_8, %c0_9], %13 {strides = array<i32>} : memref<18x64xf32, #tpu.memory_space<vmem>>, vector<1x64xf32>,
    %c17 = arith.constant 17 : index
    %c0_10 = arith.constant 0 : index
    %15 = vector.load %arg6[%c17, %c0_10] : memref<18x64xf32, #tpu.memory_space<vmem>>, vector<1x64xf32>
    tpu.vector_store %arg6[%c17, %c0_10], %13 {strides = array<i32>} : memref<18x64xf32, #tpu.memory_space<vmem>>, vector<1x64xf32>,
    %c1 = arith.constant 1 : index
    %c0_11 = arith.constant 0 : index
    %16 = vector.load %arg6[%c1, %c0_11] : memref<18x64xf32, #tpu.memory_space<vmem>>, vector<16x64xf32>
    tpu.vector_store %arg6[%c1, %c0_11], %12 {strides = array<i32>} : memref<18x64xf32, #tpu.memory_space<vmem>>, vector<16x64xf32>,
    %c0_12 = arith.constant 0 : index
    %c0_13 = arith.constant 0 : index
    %17 = vector.load %arg6[%c0_12, %c0_13] : memref<18x64xf32, #tpu.memory_space<vmem>>, vector<16x64xf32>
    %c0_14 = arith.constant 0 : index
    %c0_15 = arith.constant 0 : index
    %c0_16 = arith.constant 0 : index
    %18 = vector.load %arg2[%c0_14, %c0_15, %c0_16] : memref<3x64x64xf32, #tpu.memory_space<vmem>>, vector<1x64x64xf32>
    %19 = vector.shape_cast %18 : vector<1x64x64xf32> to vector<64x64xf32>
    %cst_17 = arith.constant dense<0.000000e+00> : vector<16x64xf32>
    %20 = tpu.matmul %17, %19, %cst_17 {dimension_numbers = #tpu.dot_dimension_numbers<[1], [0], [0], [1], [0, 0, 1, 1], [], []>} : vector<16x64xf32>, vector<64x64xf32>, vector<16x64xf32> -> vector<16x64xf32>
    %c1_18 = arith.constant 1 : index
    %c0_19 = arith.constant 0 : index
    %21 = vector.load %arg6[%c1_18, %c0_19] : memref<18x64xf32, #tpu.memory_space<vmem>>, vector<16x64xf32>
    %c1_20 = arith.constant 1 : index
    %c0_21 = arith.constant 0 : index
    %c0_22 = arith.constant 0 : index
    %22 = vector.load %arg2[%c1_20, %c0_21, %c0_22] : memref<3x64x64xf32, #tpu.memory_space<vmem>>, vector<1x64x64xf32>
    %23 = vector.shape_cast %22 : vector<1x64x64xf32> to vector<64x64xf32>
    %cst_23 = arith.constant dense<0.000000e+00> : vector<16x64xf32>
    %24 = tpu.matmul %21, %23, %cst_23 {dimension_numbers = #tpu.dot_dimension_numbers<[1], [0], [0], [1], [0, 0, 1, 1], [], []>} : vector<16x64xf32>, vector<64x64xf32>, vector<16x64xf32> -> vector<16x64xf32>
    %25 = arith.addf %20, %24 : vector<16x64xf32>
    %c2 = arith.constant 2 : index
    %c0_24 = arith.constant 0 : index
    %26 = vector.load %arg6[%c2, %c0_24] : memref<18x64xf32, #tpu.memory_space<vmem>>, vector<16x64xf32>
    %c2_25 = arith.constant 2 : index
    %c0_26 = arith.constant 0 : index
    %c0_27 = arith.constant 0 : index
    %27 = vector.load %arg2[%c2_25, %c0_26, %c0_27] : memref<3x64x64xf32, #tpu.memory_space<vmem>>, vector<1x64x64xf32>
    %28 = vector.shape_cast %27 : vector<1x64x64xf32> to vector<64x64xf32>
    %cst_28 = arith.constant dense<0.000000e+00> : vector<16x64xf32>
    %29 = tpu.matmul %26, %28, %cst_28 {dimension_numbers = #tpu.dot_dimension_numbers<[1], [0], [0], [1], [0, 0, 1, 1], [], []>} : vector<16x64xf32>, vector<64x64xf32>, vector<16x64xf32> -> vector<16x64xf32>
    %30 = arith.addf %25, %29 : vector<16x64xf32>
    %c0_29 = arith.constant 0 : index
    %c0_30 = arith.constant 0 : index
    %c0_31 = arith.constant 0 : index
    %31 = vector.load %arg5[%c0_29, %c0_30, %c0_31] : memref<1x16x64xf32, #tpu.memory_space<vmem>>, vector<1x16x64xf32>
    %32 = vector.shape_cast %31 : vector<1x16x64xf32> to vector<16x64xf32>
    %33 = vector.shape_cast %30 : vector<16x64xf32> to vector<1x16x64xf32>
    tpu.vector_store %arg5[%c0_29, %c0_30, %c0_31], %33 {strides = array<i32>} : memref<1x16x64xf32, #tpu.memory_space<vmem>>, vector<1x16x64xf32>,
    return
  }
  func.func @transform_0(%arg0: i32) -> (i32, i32, i32) {
    %c0_i32 = arith.constant 0 : i32
    %c0_i32_0 = arith.constant 0 : i32
    %c0_i32_1 = arith.constant 0 : i32
    return %arg0, %c0_i32, %c0_i32_0 : i32, i32, i32
  }
  func.func @transform_1(%arg0: i32) -> (i32, i32, i32) {
    %c0_i32 = arith.constant 0 : i32
    %c0_i32_0 = arith.constant 0 : i32
    %c0_i32_1 = arith.constant 0 : i32
    %c0_i32_2 = arith.constant 0 : i32
    return %c0_i32, %c0_i32_0, %c0_i32_1 : i32, i32, i32
  }
  func.func @transform_2(%arg0: i32) -> (i32, i32) {
    %c0_i32 = arith.constant 0 : i32
    %c0_i32_0 = arith.constant 0 : i32
    %c0_i32_1 = arith.constant 0 : i32
    return %c0_i32, %c0_i32_0 : i32, i32
  }
  func.func @transform_3(%arg0: i32) -> (i32, i32) {
    %c0_i32 = arith.constant 0 : i32
    %c0_i32_0 = arith.constant 0 : i32
    %c0_i32_1 = arith.constant 0 : i32
    return %c0_i32, %c0_i32_0 : i32, i32
  }
  func.func @transform_4(%arg0: i32) -> (i32, i32, i32) {
    %c0_i32 = arith.constant 0 : i32
    %c0_i32_0 = arith.constant 0 : i32
    %c0_i32_1 = arith.constant 0 : i32
    return %arg0, %c0_i32, %c0_i32_0 : i32, i32, i32
  }
}

module attributes {stable_mosaic.version = 11 : i64} {
  func.func @_stage_res_kernel(%arg0: i32, %arg1: memref<1x16x64xf32, #tpu.memory_space<vmem>>, %arg2: memref<1x16x64xf32, #tpu.memory_space<vmem>>, %arg3: memref<3x64x64xf32, #tpu.memory_space<vmem>>, %arg4: memref<1x64xf32, #tpu.memory_space<vmem>>, %arg5: memref<1x64xf32, #tpu.memory_space<vmem>>, %arg6: memref<1x16x64xf32, #tpu.memory_space<vmem>>, %arg7: memref<18x64xf32, #tpu.memory_space<vmem>>) attributes {dimension_semantics = [#tpu.dimension_semantics<parallel>], iteration_bounds = array<i64: 2>, scalar_prefetch = 0 : i64, scratch_operands = 1 : i64, tpu.core_type = #tpu.core_type<tc>, window_params = [{transform_indices = @transform_0, window_bounds = array<i64: 1, 16, 64>}, {transform_indices = @transform_1, window_bounds = array<i64: 1, 16, 64>}, {pipeline_mode = #tpu.pipeline_mode<synchronous>, transform_indices = @transform_2, window_bounds = array<i64: 3, 64, 64>}, {pipeline_mode = #tpu.pipeline_mode<synchronous>, transform_indices = @transform_3, window_bounds = array<i64: 1, 64>}, {pipeline_mode = #tpu.pipeline_mode<synchronous>, transform_indices = @transform_4, window_bounds = array<i64: 1, 64>}, {transform_indices = @transform_5, window_bounds = array<i64: 1, 16, 64>}]} {
    %c0 = arith.constant 0 : index
    %c0_0 = arith.constant 0 : index
    %c0_1 = arith.constant 0 : index
    %0 = vector.load %arg1[%c0, %c0_0, %c0_1] : memref<1x16x64xf32, #tpu.memory_space<vmem>>, vector<1x16x64xf32>
    %1 = vector.shape_cast %0 : vector<1x16x64xf32> to vector<16x64xf32>
    %c0_2 = arith.constant 0 : index
    %c0_3 = arith.constant 0 : index
    %2 = vector.load %arg4[%c0_2, %c0_3] : memref<1x64xf32, #tpu.memory_space<vmem>>, vector<1x64xf32>
    %3 = vector.broadcast %2 : vector<1x64xf32> to vector<16x64xf32>
    %4 = arith.mulf %1, %3 : vector<16x64xf32>
    %c0_4 = arith.constant 0 : index
    %c0_5 = arith.constant 0 : index
    %5 = vector.load %arg5[%c0_4, %c0_5] : memref<1x64xf32, #tpu.memory_space<vmem>>, vector<1x64xf32>
    %6 = vector.broadcast %5 : vector<1x64xf32> to vector<16x64xf32>
    %7 = arith.addf %4, %6 : vector<16x64xf32>
    %cst = arith.constant 0.000000e+00 : f32
    %8 = vector.broadcast %cst : f32 to vector<16x64xf32>
    %9 = arith.cmpf ogt, %7, %8 : vector<16x64xf32>
    %cst_6 = arith.constant 0.00999999977 : f32
    %10 = vector.broadcast %cst_6 : f32 to vector<16x64xf32>
    %11 = arith.mulf %10, %7 : vector<16x64xf32>
    %12 = arith.select %9, %7, %11 : vector<16x64xi1>, vector<16x64xf32>
    %cst_7 = arith.constant 0.000000e+00 : f32
    %13 = vector.broadcast %cst_7 : f32 to vector<1x64xf32>
    %c0_8 = arith.constant 0 : index
    %c0_9 = arith.constant 0 : index
    %14 = vector.load %arg7[%c0_8, %c0_9] : memref<18x64xf32, #tpu.memory_space<vmem>>, vector<1x64xf32>
    tpu.vector_store %arg7[%c0_8, %c0_9], %13 {strides = array<i32>} : memref<18x64xf32, #tpu.memory_space<vmem>>, vector<1x64xf32>,
    %c17 = arith.constant 17 : index
    %c0_10 = arith.constant 0 : index
    %15 = vector.load %arg7[%c17, %c0_10] : memref<18x64xf32, #tpu.memory_space<vmem>>, vector<1x64xf32>
    tpu.vector_store %arg7[%c17, %c0_10], %13 {strides = array<i32>} : memref<18x64xf32, #tpu.memory_space<vmem>>, vector<1x64xf32>,
    %c1 = arith.constant 1 : index
    %c0_11 = arith.constant 0 : index
    %16 = vector.load %arg7[%c1, %c0_11] : memref<18x64xf32, #tpu.memory_space<vmem>>, vector<16x64xf32>
    tpu.vector_store %arg7[%c1, %c0_11], %12 {strides = array<i32>} : memref<18x64xf32, #tpu.memory_space<vmem>>, vector<16x64xf32>,
    %c0_12 = arith.constant 0 : index
    %c0_13 = arith.constant 0 : index
    %17 = vector.load %arg7[%c0_12, %c0_13] : memref<18x64xf32, #tpu.memory_space<vmem>>, vector<16x64xf32>
    %c0_14 = arith.constant 0 : index
    %c0_15 = arith.constant 0 : index
    %c0_16 = arith.constant 0 : index
    %18 = vector.load %arg3[%c0_14, %c0_15, %c0_16] : memref<3x64x64xf32, #tpu.memory_space<vmem>>, vector<1x64x64xf32>
    %19 = vector.shape_cast %18 : vector<1x64x64xf32> to vector<64x64xf32>
    %cst_17 = arith.constant dense<0.000000e+00> : vector<16x64xf32>
    %20 = tpu.matmul %17, %19, %cst_17 {dimension_numbers = #tpu.dot_dimension_numbers<[1], [0], [0], [1], [0, 0, 1, 1], [], []>} : vector<16x64xf32>, vector<64x64xf32>, vector<16x64xf32> -> vector<16x64xf32>
    %c1_18 = arith.constant 1 : index
    %c0_19 = arith.constant 0 : index
    %21 = vector.load %arg7[%c1_18, %c0_19] : memref<18x64xf32, #tpu.memory_space<vmem>>, vector<16x64xf32>
    %c1_20 = arith.constant 1 : index
    %c0_21 = arith.constant 0 : index
    %c0_22 = arith.constant 0 : index
    %22 = vector.load %arg3[%c1_20, %c0_21, %c0_22] : memref<3x64x64xf32, #tpu.memory_space<vmem>>, vector<1x64x64xf32>
    %23 = vector.shape_cast %22 : vector<1x64x64xf32> to vector<64x64xf32>
    %cst_23 = arith.constant dense<0.000000e+00> : vector<16x64xf32>
    %24 = tpu.matmul %21, %23, %cst_23 {dimension_numbers = #tpu.dot_dimension_numbers<[1], [0], [0], [1], [0, 0, 1, 1], [], []>} : vector<16x64xf32>, vector<64x64xf32>, vector<16x64xf32> -> vector<16x64xf32>
    %25 = arith.addf %20, %24 : vector<16x64xf32>
    %c2 = arith.constant 2 : index
    %c0_24 = arith.constant 0 : index
    %26 = vector.load %arg7[%c2, %c0_24] : memref<18x64xf32, #tpu.memory_space<vmem>>, vector<16x64xf32>
    %c2_25 = arith.constant 2 : index
    %c0_26 = arith.constant 0 : index
    %c0_27 = arith.constant 0 : index
    %27 = vector.load %arg3[%c2_25, %c0_26, %c0_27] : memref<3x64x64xf32, #tpu.memory_space<vmem>>, vector<1x64x64xf32>
    %28 = vector.shape_cast %27 : vector<1x64x64xf32> to vector<64x64xf32>
    %cst_28 = arith.constant dense<0.000000e+00> : vector<16x64xf32>
    %29 = tpu.matmul %26, %28, %cst_28 {dimension_numbers = #tpu.dot_dimension_numbers<[1], [0], [0], [1], [0, 0, 1, 1], [], []>} : vector<16x64xf32>, vector<64x64xf32>, vector<16x64xf32> -> vector<16x64xf32>
    %30 = arith.addf %25, %29 : vector<16x64xf32>
    %c0_29 = arith.constant 0 : index
    %c0_30 = arith.constant 0 : index
    %c0_31 = arith.constant 0 : index
    %31 = vector.load %arg2[%c0_29, %c0_30, %c0_31] : memref<1x16x64xf32, #tpu.memory_space<vmem>>, vector<1x16x64xf32>
    %32 = vector.shape_cast %31 : vector<1x16x64xf32> to vector<16x64xf32>
    %33 = arith.addf %30, %32 : vector<16x64xf32>
    %c0_32 = arith.constant 0 : index
    %c0_33 = arith.constant 0 : index
    %c0_34 = arith.constant 0 : index
    %34 = vector.load %arg6[%c0_32, %c0_33, %c0_34] : memref<1x16x64xf32, #tpu.memory_space<vmem>>, vector<1x16x64xf32>
    %35 = vector.shape_cast %34 : vector<1x16x64xf32> to vector<16x64xf32>
    %36 = vector.shape_cast %33 : vector<16x64xf32> to vector<1x16x64xf32>
    tpu.vector_store %arg6[%c0_32, %c0_33, %c0_34], %36 {strides = array<i32>} : memref<1x16x64xf32, #tpu.memory_space<vmem>>, vector<1x16x64xf32>,
    return
  }
  func.func @transform_0(%arg0: i32) -> (i32, i32, i32) {
    %c0_i32 = arith.constant 0 : i32
    %c0_i32_0 = arith.constant 0 : i32
    %c0_i32_1 = arith.constant 0 : i32
    return %arg0, %c0_i32, %c0_i32_0 : i32, i32, i32
  }
  func.func @transform_1(%arg0: i32) -> (i32, i32, i32) {
    %c0_i32 = arith.constant 0 : i32
    %c0_i32_0 = arith.constant 0 : i32
    %c0_i32_1 = arith.constant 0 : i32
    return %arg0, %c0_i32, %c0_i32_0 : i32, i32, i32
  }
  func.func @transform_2(%arg0: i32) -> (i32, i32, i32) {
    %c0_i32 = arith.constant 0 : i32
    %c0_i32_0 = arith.constant 0 : i32
    %c0_i32_1 = arith.constant 0 : i32
    %c0_i32_2 = arith.constant 0 : i32
    return %c0_i32, %c0_i32_0, %c0_i32_1 : i32, i32, i32
  }
  func.func @transform_3(%arg0: i32) -> (i32, i32) {
    %c0_i32 = arith.constant 0 : i32
    %c0_i32_0 = arith.constant 0 : i32
    %c0_i32_1 = arith.constant 0 : i32
    return %c0_i32, %c0_i32_0 : i32, i32
  }
  func.func @transform_4(%arg0: i32) -> (i32, i32) {
    %c0_i32 = arith.constant 0 : i32
    %c0_i32_0 = arith.constant 0 : i32
    %c0_i32_1 = arith.constant 0 : i32
    return %c0_i32, %c0_i32_0 : i32, i32
  }
  func.func @transform_5(%arg0: i32) -> (i32, i32, i32) {
    %c0_i32 = arith.constant 0 : i32
    %c0_i32_0 = arith.constant 0 : i32
    %c0_i32_1 = arith.constant 0 : i32
    return %arg0, %c0_i32, %c0_i32_0 : i32, i32, i32
  }
}

</mosaic_0001>

<bundles_post_ra>
// kernel: tile.23
= control target key start
LH: loop header
LB: loop body
LE: loop exit
PB: predicated region body
PF: predicated region fallthrough
CT: control target
= control target key end

     0   :  { %s28_s0 = inlined_call_operand.vmem [shape: f32[4], index: 0, kind: input, shape index: {}]   ;;  %s29_s1 = inlined_call_operand.vmem [shape: f32[16,4], index: 1, kind: output, shape index: {}]  }
   0x1   :  { %v4_v0 = vld [vmem:[%s28_s0] ss:$0 sm:$0xff] }
   0x2   :  { %5 = vst [vmem:[%s29_s1] sm:$0xff] %v4_v0 }
   0x3   :  { %8 = vst [vmem:[%s29_s1 + $0x8] sm:$0xff] %v4_v0 }

// kernel: tile.24
= control target key start
LH: loop header
LB: loop body
LE: loop exit
PB: predicated region body
PF: predicated region fallthrough
CT: control target
= control target key end

     0   :  { %s131_s10 = smov 60   ;;  %s132_s11 = smov 52   ;;  %vm3_vm0 = vcmask 31744   ;;  %vm9_vm1 = vcmask 523744   ;;  %vm15_vm2 = vcmask 490944   ;;  %vm21_vm3 = vcmask 458144   ;;  %s207_s0 = inlined_call_operand.vmem [shape: f32[16,4], index: 0, kind: input, shape index: {}]   ;;  %s208_s1 = inlined_call_operand.vmem [shape: f32[1,64], index: 1, kind: output, shape index: {}]  }
   0x1   :  { %v101_v0 = vld [vmem:[%s207_s0 + $0xf] sm:$0x1]   ;;  %v103_v1 = vld [vmem:[%s207_s0 + $0xd] sm:$0x1]   ;;  %v105_v2 = vld [vmem:[%s207_s0 + $0xb] sm:$0x1]  }
   0x2   :  { %7 = vrot.lane.b32.xlu0 %v101_v0, %s131_s10  ;;  %19 = vrot.lane.b32.xlu1 %v103_v1, %s132_s11  ;;  %s133_s14 = smov 44   ;;  %v102_v3 = vld [vmem:[%s207_s0 + $0xe] sm:$0x1]   ;;  %v104_v4 = vld [vmem:[%s207_s0 + $0xc] sm:$0x1]   ;;  %s134_s19 = smov 56  }
   0x3   :  { %31 = vrot.lane.b32.xlu2 %v105_v2, %s133_s14  ;;  %s135_s20 = smov 48   ;;  %v106_v5 = vld [vmem:[%s207_s0 + $0xa] sm:$0x1]   ;;  %s136_s23 = smov 40   ;;  %v107_v6 = vld [vmem:[%s207_s0 + $0x9] sm:$0x1]  }
   0x4   :  { %v108_v7 = vld [vmem:[%s207_s0 + $0x8] sm:$0x1]   ;;  %s137_s28 = smov 36   ;;  %s138_s29 = smov 32   ;;  %v109_v8 = vld [vmem:[%s207_s0 + $0x7] sm:$0x1]  }
   0x5   :  { %s139_s3 = smov 28   ;;  %v110_v9 = vld [vmem:[%s207_s0 + $0x6] sm:$0x1]   ;;  %v111_v10 = vld [vmem:[%s207_s0 + $0x5] sm:$0x1]   ;;  %s140_s8 = smov 24  }
   0x6   :  { %s141_s9 = smov 20   ;;  %v112_v11 = vld [vmem:[%s207_s0 + $0x4] sm:$0x1]   ;;  %s142_s12 = smov 16   ;;  %v113_v12 = vld [vmem:[%s207_s0 + $0x3] sm:$0x1]  }
   0x7   :  { %v114_v13 = vld [vmem:[%s207_s0 + $0x2] sm:$0x1]   ;;  %s143_s17 = smov 12   ;;  %s144_s18 = smov 8   ;;  %v115_v14 = vld [vmem:[%s207_s0 + $0x1] sm:$0x1]  }
   0x8   :  { %s145_s21 = smov 4   ;;  %v2_v15 = vld [vmem:[%s207_s0] sm:$0x1]   ;;  %vm27_vm4 = vcmask 425344   ;;  %vm33_vm5 = vcmask 392544   ;;  %vm39_vm6 = vcmask 359744  }
   0x9   :  { %4 = vst.msk [vmem:[#allocation0] sm:$0x1] %vm3_vm0, %v2_v15   ;;  %vm45_vm7 = vcmask 326944   ;;  %vm51_vm8 = vcmask 294144   ;;  %vm57_vm9 = vcmask 261344   ;;  %vm63_vm10 = vcmask 228544  }
   0xa   :  { %13 = vrot.lane.b32.xlu0 %v102_v3, %s134_s19  ;;  %25 = vrot.lane.b32.xlu1 %v104_v4, %s135_s20  ;;  %vm69_vm11 = vcmask 195744   ;;  %vm75_vm12 = vcmask 162944   ;;  %vm81_vm13 = vcmask 130144   ;;  %vm87_vm14 = vcmask 97344  }
   0xb   :  { %37 = vrot.lane.b32.xlu2 %v106_v5, %s136_s23  ;;  %vm93_vm15 = vcmask 64544  }
  0x12   :  { %43 = vrot.lane.b32.xlu0 %v107_v6, %s137_s28  ;;  %49 = vrot.lane.b32.xlu1 %v108_v7, %s138_s29 }
  0x13   :  { %55 = vrot.lane.b32.xlu2 %v109_v8, %s139_s3 }
  0x1a   :  { %61 = vrot.lane.b32.xlu0 %v110_v9, %s140_s8  ;;  %67 = vrot.lane.b32.xlu1 %v111_v10, %s141_s9 }
  0x1b   :  { %73 = vrot.lane.b32.xlu2 %v112_v11, %s142_s12 }
  0x22   :  { %79 = vrot.lane.b32.xlu0 %v113_v12, %s143_s17  ;;  %85 = vrot.lane.b32.xlu1 %v114_v13, %s144_s18 }
  0x23   :  { %91 = vrot.lane.b32.xlu2 %v115_v14, %s145_s21 }
  0x5d   :  { %v32_v16 = vpop.permute.xlu2 %31  }
  0x65   :  { %v38_v17 = vpop.permute.xlu2 %37  }
  0x6d   :  { %v56_v18 = vpop.permute.xlu2 %55  }
  0x74   :  { %v8_v19 = vpop.permute.xlu0 %7   ;;  %v20_v20 = vpop.permute.xlu1 %19  }
  0x75   :  { %10 = vst.msk [vmem:[#allocation0] sm:$0x1] %vm9_vm1, %v8_v19   ;;  %v74_v21 = vpop.permute.xlu2 %73  }
  0x7c   :  { %v14_v22 = vpop.permute.xlu0 %13   ;;  %v26_v23 = vpop.permute.xlu1 %25  }
  0x7d   :  { %16 = vst.msk [vmem:[#allocation0] sm:$0x1] %vm15_vm2, %v14_v22   ;;  %v92_v24 = vpop.permute.xlu2 %91  }
  0x7e   :  { %22 = vst.msk [vmem:[#allocation0] sm:$0x1] %vm21_vm3, %v20_v20  }
  0x7f   :  { %28 = vst.msk [vmem:[#allocation0] sm:$0x1] %vm27_vm4, %v26_v23  }
  0x80   :  { %34 = vst.msk [vmem:[#allocation0] sm:$0x1] %vm33_vm5, %v32_v16  }
  0x81   :  { %40 = vst.msk [vmem:[#allocation0] sm:$0x1] %vm39_vm6, %v38_v17  }
  0x84   :  { %v44_v25 = vpop.permute.xlu0 %43   ;;  %v50_v26 = vpop.permute.xlu1 %49  }
  0x85   :  { %46 = vst.msk [vmem:[#allocation0] sm:$0x1] %vm45_vm7, %v44_v25  }
  0x86   :  { %52 = vst.msk [vmem:[#allocation0] sm:$0x1] %vm51_vm8, %v50_v26  }
  0x87   :  { %58 = vst.msk [vmem:[#allocation0] sm:$0x1] %vm57_vm9, %v56_v18  }
  0x8c   :  { %v62_v27 = vpop.permute.xlu0 %61   ;;  %v68_v28 = vpop.permute.xlu1 %67  }
  0x8d   :  { %64 = vst.msk [vmem:[#allocation0] sm:$0x1] %vm63_vm10, %v62_v27  }
  0x8e   :  { %70 = vst.msk [vmem:[#allocation0] sm:$0x1] %vm69_vm11, %v68_v28  }
  0x8f   :  { %76 = vst.msk [vmem:[#allocation0] sm:$0x1] %vm75_vm12, %v74_v21  }
  0x94   :  { %v80_v29 = vpop.permute.xlu0 %79   ;;  %v86_v30 = vpop.permute.xlu1 %85  }
  0x95   :  { %82 = vst.msk [vmem:[#allocation0] sm:$0x1] %vm81_vm13, %v80_v29  }
  0x96   :  { %88 = vst.msk [vmem:[#allocation0] sm:$0x1] %vm87_vm14, %v86_v30  }
  0x97   :  { %94 = vst.msk [vmem:[#allocation0] sm:$0x1] %vm93_vm15, %v92_v24  }
  0x9e   :  { %v97_v31 = vld [vmem:[#allocation0] sm:$0x1] }
  0x9f   :  { %100 = vst [vmem:[%s208_s1] sm:$0x1] %v97_v31 }

// kernel: residual_conv_block.2
= control target key start
LH: loop header
LB: loop body
LE: loop exit
PB: predicated region body
PF: predicated region fallthrough
CT: control target
= control target key end

     0   :  { %s490_s15 = smov 0   ;;  %s604_s0 = inlined_call_operand.vmem [shape: f32[2,16,64], index: 0, kind: input, shape index: {}]   ;;  %s605_s1 = inlined_call_operand.vmem [shape: f32[3,64,64], index: 1, kind: input, shape index: {}]   ;;  %s606_s2 = inlined_call_operand.vmem [shape: f32[1,64], index: 2, kind: input, shape index: {}]   ;;  %s607_s3 = inlined_call_operand.vmem [shape: f32[1,64], index: 3, kind: input, shape index: {}]   ;;  %s608_s4 = inlined_call_operand.vmem [shape: f32[2,16,64], index: 4, kind: output, shape index: {}]  }
   0x1 LB: > { %s402_s16 = sadd.s32 4294967295, %s462_s15   ;;  %p406_p0 = scmp.ge.s32.totalorder %s462_s15, 1  ;;  %s462_s15 = sphi %s490_s15, %s14_s15  }
   0x2   : > { %p162_p1 = scmp.lt.s32.totalorder %s462_s15, 3 }
   0x4   : > { %p163_p2 = pnand %p406_p0, %p162_p1 }
   0x5   : > { %p188_p3 = scmp.lt.s32.totalorder (!%p163_p2), %s402_s16, 1 }
   0x6   : > { %166 = sbr.rel (%p163_p2) target bundleno = 179 (0xb3), region = 36 }
   0xb   : > { %v430_v0 = vld [vmem:[%s605_s1 + $0xb8] sm:$0xff]  ;;  %v429_v1 = vld [vmem:[%s605_s1 + $0xb0] sm:$0xff]  ;;  %vm218_vm0 = vcmask 516096   ;;  %v428_v5 = vld [vmem:[%s605_s1 + $0xa8] sm:$0xff]  ;;  %s610_s16 = smov (!%p188_p3, %s402_s16), 1  ;;  %v464_v8 = vmov 0.0  }
   0xc   : > { %v418_v2 = vld [vmem:[%s605_s1 + $0x78] sm:$0xff]  ;;  %328 = vmatpush.msra.mxu2 %v430_v0  ;;  %v417_v4 = vld [vmem:[%s605_s1 + $0x70] sm:$0xff]  ;;  %v416_v7 = vld [vmem:[%s605_s1 + $0x68] sm:$0xff]  ;;  %219 = vst.msk [vmem:[#allocation2] sm:$0x1] %vm218_vm0, %v464_v8  ;;  %s435_s13 = sshll.u32 %s610_s16, 4 }
   0xd   : > { %259 = vmatpush.msra.mxu0 %v418_v2  ;;  %v233_v3 = vld [vmem:[%s605_s1 + $0x38] sm:$0xff]  ;;  %437 = vmatpush.msra.mxu3 %v418_v2  ;;  %v232_v6 = vld [vmem:[%s605_s1 + $0x30] sm:$0xff]  ;;  %v231_v9 = vld [vmem:[%s605_s1 + $0x28] sm:$0xff]  ;;  %220 = vst.msk [vmem:[#allocation2 + $0x11] sm:$0x1] %vm218_vm0, %v464_v8  ;;  %s192_s22 = scalar_lea.vmem %s604_s0, %s435_s13  ;;  %vm221_vm1 = vcmask 523264   ;;  %s197_s28 = scalar_lea.vmem %s608_s4, %s435_s13 }
   0xe   : > { %288 = vmatpush.msra.mxu1 %v233_v3  ;;  %329 = vmatpush.msra.mxu2 %v429_v1  ;;  %v427_v10 = vld [vmem:[%s605_s1 + $0xa0] sm:$0xff]  ;;  %v426_v12 = vld [vmem:[%s605_s1 + $0x98] sm:$0xff]  ;;  %v425_v14 = vld [vmem:[%s605_s1 + $0x90] sm:$0xff] }
   0xf   : > { %260 = vmatpush.msra.mxu0 %v417_v4  ;;  %438 = vmatpush.msra.mxu3 %v417_v4  ;;  %v415_v11 = vld [vmem:[%s605_s1 + $0x60] sm:$0xff]  ;;  %v414_v15 = vld [vmem:[%s605_s1 + $0x58] sm:$0xff]  ;;  %v199_v18 = vld [vmem:[%s192_s22 + $0x8] sm:$0xff] }
  0x10   : > { %289 = vmatpush.msra.mxu1 %v232_v6  ;;  %330 = vmatpush.msra.mxu2 %v428_v5  ;;  %v230_v13 = vld [vmem:[%s605_s1 + $0x20] sm:$0xff]  ;;  %v229_v16 = vld [vmem:[%s605_s1 + $0x18] sm:$0xff]  ;;  %v413_v20 = vld [vmem:[%s605_s1 + $0x50] sm:$0xff] }
  0x11   : > { %261 = vmatpush.msra.mxu0 %v416_v7  ;;  %439 = vmatpush.msra.mxu3 %v416_v7  ;;  %v198_v17 = vld [vmem:[%s192_s22] sm:$0xff]  ;;  %v228_v22 = vld [vmem:[%s605_s1 + $0x10] sm:$0xff]  ;;  %v424_v25 = vld [vmem:[%s605_s1 + $0x88] sm:$0xff] }
  0x12   : > { %290 = vmatpush.msra.mxu1 %v231_v9  ;;  %331 = vmatpush.msra.mxu2 %v427_v10  ;;  %v454_v19 = vld [vmem:[%s606_s2] ss:$0 sm:$0xff]  ;;  %v412_v26 = vld [vmem:[%s605_s1 + $0x48] sm:$0xff] }
  0x13   : > { %262 = vmatpush.msra.mxu0 %v415_v11  ;;  %440 = vmatpush.msra.mxu3 %v415_v11  ;;  %v455_v21 = vld [vmem:[%s607_s3] ss:$0 sm:$0xff]  ;;  %v204_v23 = vmul.f32 %v454_v19, %v198_v17  ;;  %v205_v24 = vmul.f32 %v454_v19, %v199_v18  ;;  %v227_v29 = vld [vmem:[%s605_s1 + $0x8] sm:$0xff] }
  0x14   : > { %291 = vmatpush.msra.mxu1 %v230_v13  ;;  %332 = vmatpush.msra.mxu2 %v426_v12  ;;  %v423_v30 = vld [vmem:[%s605_s1 + $0x80] sm:$0xff] }
  0x15   : > { %263 = vmatpush.msra.mxu0 %v414_v15  ;;  %441 = vmatpush.msra.mxu3 %v414_v15  ;;  %v210_v27 = vadd.f32 %v455_v21, %v204_v23  ;;  %v211_v28 = vadd.f32 %v455_v21, %v205_v24  ;;  %v411_v31 = vld [vmem:[%s605_s1 + $0x40] sm:$0xff] }
  0x16   : > { %292 = vmatpush.msra.mxu1 %v229_v16  ;;  %333 = vmatpush.msra.mxu2 %v425_v14  ;;  %v226_v32 = vld [vmem:[%s605_s1] sm:$0xff] }
  0x17   : > { %264 = vmatpush.msra.mxu0 %v413_v20  ;;  %442 = vmatpush.msra.mxu3 %v413_v20  ;;  %vm212_vm2 = vcmp.gt.f32.partialorder %v210_v27, 0.0  ;;  %vm213_vm3 = vcmp.gt.f32.partialorder %v211_v28, 0.0  ;;  %v214_v33 = vmul.f32 0.01, %v210_v27  ;;  %v215_v34 = vmul.f32 0.01, %v211_v28 }
  0x18   : > { %293 = vmatpush.msra.mxu1 %v228_v22  ;;  %334 = vmatpush.msra.mxu2 %v424_v25 }
  0x19   : > { %265 = vmatpush.msra.mxu0 %v412_v26  ;;  %443 = vmatpush.msra.mxu3 %v412_v26  ;;  %v216_v35 = vsel %vm212_vm2, %v210_v27, %v214_v33  ;;  %v217_v36 = vsel %vm213_vm3, %v211_v28, %v215_v34 }
  0x1a   : > { %294 = vmatpush.msra.mxu1 %v227_v29  ;;  %335 = vmatpush.msra.mxu2 %v423_v30  ;;  %222 = vst.msk [vmem:[#allocation2 + $0x1] sm:$0xff] %vm221_vm1, %v216_v35 }
  0x1b   : > { %266 = vmatpush.msra.mxu0 %v411_v31  ;;  %444 = vmatpush.msra.mxu3 %v411_v31  ;;  %223 = vst.msk [vmem:[#allocation2 + $0x9] sm:$0xff] %vm221_vm1, %v217_v36 }
  0x1c   : > { %295 = vmatpush.msra.mxu1 %v226_v32 }
  0x21   : > { %v234_v37 = vld [vmem:[#allocation2 + $0x1] sm:$0xff] }
  0x22   : > { %v224_v38 = vld [vmem:[#allocation2] sm:$0xff]  ;;  %419 = vmatmul.msk.f32.vlgmr.msra.gmra.mxu0 %vm221_vm1, %v234_v37  ;;  %v235_v40 = vld [vmem:[#allocation2 + $0x9] sm:$0xff] }
  0x23   : > { %v303_v39 = vld [vmem:[#allocation2 + $0x2] sm:$0xff]  ;;  %421 = vmatmul.msk.f32.vlgmr.msra.gmra.mxu1 %vm221_vm1, %v224_v38  ;;  %420 = vmatmul.msk.f32.vlgmr.msra.gmra.mxu3 %vm221_vm1, %v235_v40  ;;  %v304_v42 = vld [vmem:[#allocation2 + $0xa] sm:$0xff] }
  0x24   : > { %431 = vmatmul.msk.f32.vlgmr.msra.gmra.mxu2 %vm221_vm1, %v303_v39  ;;  %v225_v41 = vld [vmem:[#allocation2 + $0x8] sm:$0xff] }
  0x2b   : > { %422 = vmatmul.msk.f32.gmra.mxu1 %vm221_vm1, %v225_v41 }
  0x2c   : > { %432 = vmatmul.msk.f32.gmra.mxu2 %vm221_vm1, %v304_v42 }
  0x9f   : > { %v268_v44 = vpop.f32.mrf.mxu0 }
  0xa0   : > { %v297_v43 = vpop.f32.mrf.mxu1 }
  0xa1   : > { %v298_v45 = vadd.f32 %v297_v43, %v268_v44 }
  0xa6   : > { %v271_v48 = vpop.f32.mrf.mxu3 }
  0xa7   : > { %v337_v46 = vpop.f32.mrf.mxu2 }
  0xa8   : > { %v343_v47 = vadd.f32 %v337_v46, %v298_v45  ;;  %v300_v49 = vpop.f32.mrf.mxu1 }
  0xa9   : > { %v301_v50 = vadd.f32 %v300_v49, %v271_v48 }
  0xaa   : > { %345 = vst.msk [vmem:[%s197_s28] sm:$0xff] %vm221_vm1, %v343_v47 }
  0xaf   : > { %v340_v51 = vpop.f32.mrf.mxu2 }
  0xb0   : > { %v344_v52 = vadd.f32 %v340_v51, %v301_v50 }
  0xb2   : > { %346 = vst.msk [vmem:[%s197_s28 + $0x8] sm:$0xff] %vm221_vm1, %v344_v52 }
  0xb3 PF: > { %s14_s15 = sadd.s32 1, %s462_s15  }
  0xb4   : > { %p11_p4 = scmp.ge.s32.totalorder %s14_s15, 4  }
  0xb6   :  { %13 = sbr.rel (!%p11_p4) target bundleno = 1 (0x1), region = 68 }

// kernel: residual_conv_block.3
= control target key start
LH: loop header
LB: loop body
LE: loop exit
PB: predicated region body
PF: predicated region fallthrough
CT: control target
= control target key end

     0   :  { %s561_s18 = smov 0   ;;  %s676_s0 = inlined_call_operand.vmem [shape: f32[2,16,64], index: 0, kind: input, shape index: {}]   ;;  %s677_s1 = inlined_call_operand.vmem [shape: f32[2,16,64], index: 1, kind: input, shape index: {}]   ;;  %s678_s2 = inlined_call_operand.vmem [shape: f32[3,64,64], index: 2, kind: input, shape index: {}]   ;;  %s679_s3 = inlined_call_operand.vmem [shape: f32[1,64], index: 3, kind: input, shape index: {}]   ;;  %s680_s4 = inlined_call_operand.vmem [shape: f32[1,64], index: 4, kind: input, shape index: {}]   ;;  %s681_s5 = inlined_call_operand.vmem [shape: f32[2,16,64], index: 5, kind: output, shape index: {}]  }
   0x1 LB: > { %s465_s19 = sadd.s32 4294967295, %s528_s18   ;;  %p469_p0 = scmp.ge.s32.totalorder %s528_s18, 1  ;;  %s528_s18 = sphi %s561_s18, %s15_s18  }
   0x2   : > { %p197_p1 = scmp.lt.s32.totalorder %s528_s18, 3 }
   0x4   : > { %p198_p2 = pnand %p469_p0, %p197_p1 }
   0x5   : > { %p230_p3 = scmp.lt.s32.totalorder (!%p198_p2), %s465_s19, 1 }
   0x6   : > { %201 = sbr.rel (%p198_p2) target bundleno = 181 (0xb5), region = 40 }
   0xb   : > { %v495_v0 = vld [vmem:[%s678_s2 + $0xb8] sm:$0xff]  ;;  %v494_v1 = vld [vmem:[%s678_s2 + $0xb0] sm:$0xff]  ;;  %vm265_vm0 = vcmask 516096   ;;  %v493_v5 = vld [vmem:[%s678_s2 + $0xa8] sm:$0xff]  ;;  %s683_s19 = smov (!%p230_p3, %s465_s19), 1  ;;  %v530_v8 = vmov 0.0  }
   0xc   : > { %v483_v2 = vld [vmem:[%s678_s2 + $0x78] sm:$0xff]  ;;  %375 = vmatpush.msra.mxu2 %v495_v0  ;;  %v482_v4 = vld [vmem:[%s678_s2 + $0x70] sm:$0xff]  ;;  %v481_v7 = vld [vmem:[%s678_s2 + $0x68] sm:$0xff]  ;;  %266 = vst.msk [vmem:[#allocation2] sm:$0x1] %vm265_vm0, %v530_v8  ;;  %s604_s17 = sshll.u32 %s683_s19, 4 }
   0xd   : > { %306 = vmatpush.msra.mxu0 %v483_v2  ;;  %v280_v3 = vld [vmem:[%s678_s2 + $0x38] sm:$0xff]  ;;  %503 = vmatpush.msra.mxu3 %v483_v2  ;;  %v279_v6 = vld [vmem:[%s678_s2 + $0x30] sm:$0xff]  ;;  %v278_v9 = vld [vmem:[%s678_s2 + $0x28] sm:$0xff]  ;;  %267 = vst.msk [vmem:[#allocation2 + $0x11] sm:$0x1] %vm265_vm0, %v530_v8  ;;  %s234_s26 = scalar_lea.vmem %s676_s0, %s604_s17  ;;  %vm268_vm1 = vcmask 523264   ;;  %s239_s6 = scalar_lea.vmem %s677_s1, %s604_s17 }
   0xe   : > { %335 = vmatpush.msra.mxu1 %v280_v3  ;;  %376 = vmatpush.msra.mxu2 %v494_v1  ;;  %v492_v10 = vld [vmem:[%s678_s2 + $0xa0] sm:$0xff]  ;;  %v491_v12 = vld [vmem:[%s678_s2 + $0x98] sm:$0xff]  ;;  %v490_v14 = vld [vmem:[%s678_s2 + $0x90] sm:$0xff]  ;;  %s244_s9 = scalar_lea.vmem %s681_s5, %s604_s17 }
   0xf   : > { %307 = vmatpush.msra.mxu0 %v482_v4  ;;  %504 = vmatpush.msra.mxu3 %v482_v4  ;;  %v480_v11 = vld [vmem:[%s678_s2 + $0x60] sm:$0xff]  ;;  %v479_v15 = vld [vmem:[%s678_s2 + $0x58] sm:$0xff]  ;;  %v246_v18 = vld [vmem:[%s234_s26 + $0x8] sm:$0xff] }
  0x10   : > { %336 = vmatpush.msra.mxu1 %v279_v6  ;;  %377 = vmatpush.msra.mxu2 %v493_v5  ;;  %v277_v13 = vld [vmem:[%s678_s2 + $0x20] sm:$0xff]  ;;  %v276_v16 = vld [vmem:[%s678_s2 + $0x18] sm:$0xff]  ;;  %v478_v20 = vld [vmem:[%s678_s2 + $0x50] sm:$0xff] }
  0x11   : > { %308 = vmatpush.msra.mxu0 %v481_v7  ;;  %505 = vmatpush.msra.mxu3 %v481_v7  ;;  %v245_v17 = vld [vmem:[%s234_s26] sm:$0xff]  ;;  %v275_v22 = vld [vmem:[%s678_s2 + $0x10] sm:$0xff]  ;;  %v489_v25 = vld [vmem:[%s678_s2 + $0x88] sm:$0xff] }
  0x12   : > { %337 = vmatpush.msra.mxu1 %v278_v9  ;;  %378 = vmatpush.msra.mxu2 %v492_v10  ;;  %v520_v19 = vld [vmem:[%s679_s3] ss:$0 sm:$0xff]  ;;  %v477_v26 = vld [vmem:[%s678_s2 + $0x48] sm:$0xff] }
  0x13   : > { %309 = vmatpush.msra.mxu0 %v480_v11  ;;  %506 = vmatpush.msra.mxu3 %v480_v11  ;;  %v521_v21 = vld [vmem:[%s680_s4] ss:$0 sm:$0xff]  ;;  %v251_v23 = vmul.f32 %v520_v19, %v245_v17  ;;  %v252_v24 = vmul.f32 %v520_v19, %v246_v18  ;;  %v274_v29 = vld [vmem:[%s678_s2 + $0x8] sm:$0xff] }
  0x14   : > { %338 = vmatpush.msra.mxu1 %v277_v13  ;;  %379 = vmatpush.msra.mxu2 %v491_v12  ;;  %v488_v30 = vld [vmem:[%s678_s2 + $0x80] sm:$0xff]  ;;  %v393_v54 = vld [vmem:[%s239_s6 + $0x8] sm:$0xff] }
  0x15   : > { %310 = vmatpush.msra.mxu0 %v479_v15  ;;  %507 = vmatpush.msra.mxu3 %v479_v15  ;;  %v257_v27 = vadd.f32 %v521_v21, %v251_v23  ;;  %v258_v28 = vadd.f32 %v521_v21, %v252_v24  ;;  %v476_v31 = vld [vmem:[%s678_s2 + $0x40] sm:$0xff] }
  0x16   : > { %339 = vmatpush.msra.mxu1 %v276_v16  ;;  %380 = vmatpush.msra.mxu2 %v490_v14  ;;  %v273_v32 = vld [vmem:[%s678_s2] sm:$0xff] }
  0x17   : > { %311 = vmatpush.msra.mxu0 %v478_v20  ;;  %508 = vmatpush.msra.mxu3 %v478_v20  ;;  %vm259_vm2 = vcmp.gt.f32.partialorder %v257_v27, 0.0  ;;  %vm260_vm3 = vcmp.gt.f32.partialorder %v258_v28, 0.0  ;;  %v261_v33 = vmul.f32 0.01, %v257_v27  ;;  %v262_v34 = vmul.f32 0.01, %v258_v28 }
  0x18   : > { %340 = vmatpush.msra.mxu1 %v275_v22  ;;  %381 = vmatpush.msra.mxu2 %v489_v25  ;;  %v392_v47 = vld [vmem:[%s239_s6] sm:$0xff] }
  0x19   : > { %312 = vmatpush.msra.mxu0 %v477_v26  ;;  %509 = vmatpush.msra.mxu3 %v477_v26  ;;  %v263_v35 = vsel %vm259_vm2, %v257_v27, %v261_v33  ;;  %v264_v36 = vsel %vm260_vm3, %v258_v28, %v262_v34 }
  0x1a   : > { %341 = vmatpush.msra.mxu1 %v274_v29  ;;  %382 = vmatpush.msra.mxu2 %v488_v30  ;;  %269 = vst.msk [vmem:[#allocation2 + $0x1] sm:$0xff] %vm268_vm1, %v263_v35 }
  0x1b   : > { %313 = vmatpush.msra.mxu0 %v476_v31  ;;  %510 = vmatpush.msra.mxu3 %v476_v31  ;;  %270 = vst.msk [vmem:[#allocation2 + $0x9] sm:$0xff] %vm268_vm1, %v264_v36 }
  0x1c   : > { %342 = vmatpush.msra.mxu1 %v273_v32 }
  0x21   : > { %v281_v37 = vld [vmem:[#allocation2 + $0x1] sm:$0xff] }
  0x22   : > { %v271_v38 = vld [vmem:[#allocation2] sm:$0xff]  ;;  %484 = vmatmul.msk.f32.vlgmr.msra.gmra.mxu0 %vm268_vm1, %v281_v37  ;;  %v282_v40 = vld [vmem:[#allocation2 + $0x9] sm:$0xff] }
  0x23   : > { %v350_v39 = vld [vmem:[#allocation2 + $0x2] sm:$0xff]  ;;  %486 = vmatmul.msk.f32.vlgmr.msra.gmra.mxu1 %vm268_vm1, %v271_v38  ;;  %485 = vmatmul.msk.f32.vlgmr.msra.gmra.mxu3 %vm268_vm1, %v282_v40  ;;  %v351_v42 = vld [vmem:[#allocation2 + $0xa] sm:$0xff] }
  0x24   : > { %496 = vmatmul.msk.f32.vlgmr.msra.gmra.mxu2 %vm268_vm1, %v350_v39  ;;  %v272_v41 = vld [vmem:[#allocation2 + $0x8] sm:$0xff] }
  0x2b   : > { %487 = vmatmul.msk.f32.gmra.mxu1 %vm268_vm1, %v272_v41 }
  0x2c   : > { %497 = vmatmul.msk.f32.gmra.mxu2 %vm268_vm1, %v351_v42 }
  0x9f   : > { %v315_v44 = vpop.f32.mrf.mxu0 }
  0xa0   : > { %v344_v43 = vpop.f32.mrf.mxu1 }
  0xa1   : > { %v345_v45 = vadd.f32 %v344_v43, %v315_v44 }
  0xa6   : > { %v318_v49 = vpop.f32.mrf.mxu3 }
  0xa7   : > { %v384_v46 = vpop.f32.mrf.mxu2 }
  0xa8   : > { %v390_v48 = vadd.f32 %v384_v46, %v345_v45  ;;  %v347_v50 = vpop.f32.mrf.mxu1 }
  0xa9   : > { %v348_v52 = vadd.f32 %v347_v50, %v318_v49 }
  0xaa   : > { %v394_v51 = vadd.f32 %v392_v47, %v390_v48 }
  0xac   : > { %396 = vst.msk [vmem:[%s244_s9] sm:$0xff] %vm268_vm1, %v394_v51 }
  0xaf   : > { %v387_v53 = vpop.f32.mrf.mxu2 }
  0xb0   : > { %v391_v55 = vadd.f32 %v387_v53, %v348_v52 }
  0xb2   : > { %v395_v56 = vadd.f32 %v393_v54, %v391_v55 }
  0xb4   : > { %397 = vst.msk [vmem:[%s244_s9 + $0x8] sm:$0xff] %vm268_vm1, %v395_v56 }
  0xb5 PF: > { %s15_s18 = sadd.s32 1, %s528_s18  }
  0xb6   : > { %p12_p4 = scmp.ge.s32.totalorder %s15_s18, 4  }
  0xb8   :  { %14 = sbr.rel (!%p12_p4) target bundleno = 1 (0x1), region = 75 }

</bundles_post_ra>
